<compile_context>
chip_gen: v6e
topology: v6e:2x2x1
jax: 0.10.0
libtpu: 0.0.40
codegen_flags: <defaults>
</compile_context>

<pallas_src>
import functools

import jax
import jax.numpy as jnp
from jax.experimental import pallas as pl
from jax.experimental.pallas import tpu as pltpu


def _transformer_layer_kernel(x_ref, wq_ref, wk_ref, wv_ref,
                              wiq_ref, wik_ref, wiv_ref, bin_ref,
                              wo_ref, bo_ref, w1_ref, w2_ref,
                              o_ref, *, num_heads):
    # x_ref: (1, L, C); weight refs: (C, C) pre-transposed; bin_ref: (3, C); bo_ref: (1, C)
    x = x_ref[0]                               # (L, C) f32
    L, C = x.shape
    hd = C // num_heads
    scale = 1.0 / float(hd) ** 0.5

    def mm(a, b):
        return jnp.dot(a, b, preferred_element_type=jnp.float32)

    b_in = bin_ref[...]                        # (3, C): q/k/v in_proj biases

    # module's bias-free q/k/v Linears followed by MHA in-projections (+bias)
    q = mm(mm(x, wq_ref[...]), wiq_ref[...]) + b_in[0:1, :]
    k = mm(mm(x, wk_ref[...]), wik_ref[...]) + b_in[1:2, :]
    v = mm(mm(x, wv_ref[...]), wiv_ref[...]) + b_in[2:3, :]

    # per-head scaled-dot-product attention; out_proj folded in per head so no
    # lane-dimension concatenate is needed.
    wo_t = wo_ref[...]                         # (C, C) = out_proj.weight.T
    attn_out = jnp.zeros((L, C), jnp.float32)
    for h in range(num_heads):                 # static unroll (num_heads is small)
        lo, hi = h * hd, (h + 1) * hd
        qh, kh, vh = q[:, lo:hi], k[:, lo:hi], v[:, lo:hi]
        # scores = qh @ kh.T * scale   (contract on head_dim, no explicit transpose)
        s = jax.lax.dot_general(qh, kh, (((1,), (1,)), ((), ())),
                                preferred_element_type=jnp.float32) * scale
        m = jnp.max(s, axis=-1, keepdims=True)
        e = jnp.exp(s - m)
        den = jnp.sum(e, axis=-1, keepdims=True)
        p = e * pl.reciprocal(den, approx=False)   # exact: keep softmax at f32 accuracy
        ctx_h = mm(p, vh)                          # (L, hd)
        attn_out = attn_out + mm(ctx_h, wo_t[lo:hi, :])
    attn_out = attn_out + bo_ref[...]              # out_proj bias

    x1 = attn_out + x                              # residual 1
    y = mm(mm(x1, w1_ref[...]), w2_ref[...]) + x1  # fc2(fc1(x)) + x  (residual 2)
    o_ref[0] = y


def transformer_layer_forward(x, wq, wk, wv, in_proj_w, in_proj_b,
                              out_proj_w, out_proj_b, w1, w2, *, num_heads):
    """x: (L, B, C) f32 (PyTorch seq-first layout). Returns (L, B, C) f32."""
    L, B, C = x.shape
    assert C % num_heads == 0

    # one-time layout plumbing in the wrapper (not per-step work):
    xb = jnp.transpose(x, (1, 0, 2))                       # (B, L, C)
    wiq, wik, wiv = jnp.split(in_proj_w, 3, axis=0)        # each (C, C)
    biq, bik, biv = jnp.split(in_proj_b, 3)
    b_in = jnp.stack([biq, bik, biv], axis=0)              # (3, C)
    bo2 = out_proj_b.reshape(1, C)
    args = (xb, wq.T, wk.T, wv.T, wiq.T, wik.T, wiv.T, b_in,
            out_proj_w.T, bo2, w1.T, w2.T)

    w_spec = pl.BlockSpec((C, C), lambda b: (0, 0))
    kernel = functools.partial(_transformer_layer_kernel, num_heads=num_heads)

    out_b = pl.pallas_call(
        kernel,
        out_shape=jax.ShapeDtypeStruct((B, L, C), jnp.float32),
        grid_spec=pltpu.PrefetchScalarGridSpec(
            num_scalar_prefetch=0,
            grid=(B,),
            in_specs=[
                pl.BlockSpec((1, L, C), lambda b: (b, 0, 0)),   # x (per-batch block)
                w_spec, w_spec, w_spec,                         # Wq^T, Wk^T, Wv^T
                w_spec, w_spec, w_spec,                         # in_proj q/k/v (transposed)
                pl.BlockSpec((3, C), lambda b: (0, 0)),         # in_proj biases
                w_spec,                                         # out_proj.weight^T
                pl.BlockSpec((1, C), lambda b: (0, 0)),         # out_proj.bias
                w_spec, w_spec,                                 # fc1^T, fc2^T
            ],
            out_specs=pl.BlockSpec((1, L, C), lambda b: (b, 0, 0)),
        ),
        compiler_params=pltpu.CompilerParams(
            dimension_semantics=("parallel",)),                 # megacore over batch on v7x
    )(*args)

    return jnp.transpose(out_b, (1, 0, 2))                      # back to (L, B, C)


def _ref_forward(x, wq, wk, wv, in_proj_w, in_proj_b, out_proj_w, out_proj_b,
                 w1, w2, num_heads):
    """Pure-JAX reference replicating PyTorch TransformerLayer.forward."""
    hp = jax.lax.Precision.HIGHEST
    L, B, C = x.shape
    hd = C // num_heads
    proj = lambda t, w: jnp.einsum('lbc,dc->lbd', t, w, precision=hp)

    q, k, v = proj(x, wq), proj(x, wk), proj(x, wv)
    wiq, wik, wiv = jnp.split(in_proj_w, 3, axis=0)
    biq, bik, biv = jnp.split(in_proj_b, 3)
    Q = proj(q, wiq) + biq
    K = proj(k, wik) + bik
    V = proj(v, wiv) + biv

    heads = lambda t: t.reshape(L, B, num_heads, hd).transpose(1, 2, 0, 3)  # (B,H,L,hd)
    Qh, Kh, Vh = heads(Q), heads(K), heads(V)
    s = jnp.einsum('bhld,bhmd->bhlm', Qh, Kh, precision=hp) / jnp.sqrt(hd)
    p = jax.nn.softmax(s, axis=-1)
    ctx = jnp.einsum('bhlm,bhmd->bhld', p, Vh, precision=hp)
    ctx = ctx.transpose(2, 0, 1, 3).reshape(L, B, C)

    attn_out = proj(ctx, out_proj_w) + out_proj_b
    x1 = attn_out + x
    return proj(proj(x1, w1), w2) + x1


if __name__ == "__main__":
    c, num_heads, seq, batch = 32, 2, 8, 2
    key = jax.random.PRNGKey(0)
    ks = jax.random.split(key, 10)
    sw = 0.1  # deterministic small-scale "init"

    x  = jax.random.normal(ks[0], (seq, batch, c), jnp.float32)
    wq = jax.random.normal(ks[1], (c, c), jnp.float32) * sw
    wk = jax.random.normal(ks[2], (c, c), jnp.float32) * sw
    wv = jax.random.normal(ks[3], (c, c), jnp.float32) * sw
    wi = jax.random.normal(ks[4], (3 * c, c), jnp.float32) * sw   # MHA in_proj_weight
    bi = jax.random.normal(ks[5], (3 * c,), jnp.float32) * sw     # MHA in_proj_bias
    wo = jax.random.normal(ks[6], (c, c), jnp.float32) * sw       # MHA out_proj.weight
    bo = jax.random.normal(ks[7], (c,), jnp.float32) * sw         # MHA out_proj.bias
    w1 = jax.random.normal(ks[8], (c, c), jnp.float32) * sw       # fc1.weight
    w2 = jax.random.normal(ks[9], (c, c), jnp.float32) * sw       # fc2.weight

    out = transformer_layer_forward(x, wq, wk, wv, wi, bi, wo, bo, w1, w2,
                                    num_heads=num_heads)
    out = jax.block_until_ready(out)

    ref = _ref_forward(x, wq, wk, wv, wi, bi, wo, bo, w1, w2, num_heads)
    assert out.shape == (seq, batch, c)
    assert jnp.allclose(out, ref, atol=2e-3, rtol=2e-3), \
        float(jnp.max(jnp.abs(out - ref)))

    print("KERNEL_OK")
</pallas_src>

<mosaic_0001>
module attributes {stable_mosaic.version = 11 : i64} {
  func.func @_transformer_layer_kernel(%arg0: i32, %arg1: memref<1x8x32xf32, #tpu.memory_space<vmem>>, %arg2: memref<32x32xf32, #tpu.memory_space<vmem>>, %arg3: memref<32x32xf32, #tpu.memory_space<vmem>>, %arg4: memref<32x32xf32, #tpu.memory_space<vmem>>, %arg5: memref<32x32xf32, #tpu.memory_space<vmem>>, %arg6: memref<32x32xf32, #tpu.memory_space<vmem>>, %arg7: memref<32x32xf32, #tpu.memory_space<vmem>>, %arg8: memref<3x32xf32, #tpu.memory_space<vmem>>, %arg9: memref<32x32xf32, #tpu.memory_space<vmem>>, %arg10: memref<1x32xf32, #tpu.memory_space<vmem>>, %arg11: memref<32x32xf32, #tpu.memory_space<vmem>>, %arg12: memref<32x32xf32, #tpu.memory_space<vmem>>, %arg13: memref<1x8x32xf32, #tpu.memory_space<vmem>>) attributes {dimension_semantics = [#tpu.dimension_semantics<parallel>], iteration_bounds = array<i64: 2>, scalar_prefetch = 0 : i64, scratch_operands = 0 : i64, tpu.core_type = #tpu.core_type<tc>, window_params = [{transform_indices = @transform_0, window_bounds = array<i64: 1, 8, 32>}, {pipeline_mode = #tpu.pipeline_mode<synchronous>, transform_indices = @transform_1, window_bounds = array<i64: 32, 32>}, {pipeline_mode = #tpu.pipeline_mode<synchronous>, transform_indices = @transform_2, window_bounds = array<i64: 32, 32>}, {pipeline_mode = #tpu.pipeline_mode<synchronous>, transform_indices = @transform_3, window_bounds = array<i64: 32, 32>}, {pipeline_mode = #tpu.pipeline_mode<synchronous>, transform_indices = @transform_4, window_bounds = array<i64: 32, 32>}, {pipeline_mode = #tpu.pipeline_mode<synchronous>, transform_indices = @transform_5, window_bounds = array<i64: 32, 32>}, {pipeline_mode = #tpu.pipeline_mode<synchronous>, transform_indices = @transform_6, window_bounds = array<i64: 32, 32>}, {pipeline_mode = #tpu.pipeline_mode<synchronous>, transform_indices = @transform_7, window_bounds = array<i64: 3, 32>}, {pipeline_mode = #tpu.pipeline_mode<synchronous>, transform_indices = @transform_8, window_bounds = array<i64: 32, 32>}, {pipeline_mode = #tpu.pipeline_mode<synchronous>, transform_indices = @transform_9, window_bounds = array<i64: 1, 32>}, {pipeline_mode = #tpu.pipeline_mode<synchronous>, transform_indices = @transform_10, window_bounds = array<i64: 32, 32>}, {pipeline_mode = #tpu.pipeline_mode<synchronous>, transform_indices = @transform_11, window_bounds = array<i64: 32, 32>}, {transform_indices = @transform_12, window_bounds = array<i64: 1, 8, 32>}]} {
    %c0 = arith.constant 0 : index
    %c0_0 = arith.constant 0 : index
    %c0_1 = arith.constant 0 : index
    %0 = vector.load %arg1[%c0, %c0_0, %c0_1] : memref<1x8x32xf32, #tpu.memory_space<vmem>>, vector<1x8x32xf32>
    %1 = vector.shape_cast %0 : vector<1x8x32xf32> to vector<8x32xf32>
    %c0_2 = arith.constant 0 : index
    %c0_3 = arith.constant 0 : index
    %2 = vector.load %arg8[%c0_2, %c0_3] : memref<3x32xf32, #tpu.memory_space<vmem>>, vector<3x32xf32>
    %c0_4 = arith.constant 0 : index
    %c0_5 = arith.constant 0 : index
    %3 = vector.load %arg2[%c0_4, %c0_5] : memref<32x32xf32, #tpu.memory_space<vmem>>, vector<32x32xf32>
    %cst = arith.constant dense<0.000000e+00> : vector<8x32xf32>
    %4 = tpu.matmul %1, %3, %cst {dimension_numbers = #tpu.dot_dimension_numbers<[1], [0], [0], [1], [0, 0, 1, 1], [], []>} : vector<8x32xf32>, vector<32x32xf32>, vector<8x32xf32> -> vector<8x32xf32>
    %c0_6 = arith.constant 0 : index
    %c0_7 = arith.constant 0 : index
    %5 = vector.load %arg5[%c0_6, %c0_7] : memref<32x32xf32, #tpu.memory_space<vmem>>, vector<32x32xf32>
    %cst_8 = arith.constant dense<0.000000e+00> : vector<8x32xf32>
    %6 = tpu.matmul %4, %5, %cst_8 {dimension_numbers = #tpu.dot_dimension_numbers<[1], [0], [0], [1], [0, 0, 1, 1], [], []>} : vector<8x32xf32>, vector<32x32xf32>, vector<8x32xf32> -> vector<8x32xf32>
    %7 = vector.extract_strided_slice %2 {offsets = [0, 0], sizes = [1, 32], strides = [1, 1]} : vector<3x32xf32> to vector<1x32xf32>
    %8 = vector.broadcast %7 : vector<1x32xf32> to vector<8x32xf32>
    %9 = arith.addf %6, %8 : vector<8x32xf32>
    %c0_9 = arith.constant 0 : index
    %c0_10 = arith.constant 0 : index
    %10 = vector.load %arg3[%c0_9, %c0_10] : memref<32x32xf32, #tpu.memory_space<vmem>>, vector<32x32xf32>
    %cst_11 = arith.constant dense<0.000000e+00> : vector<8x32xf32>
    %11 = tpu.matmul %1, %10, %cst_11 {dimension_numbers = #tpu.dot_dimension_numbers<[1], [0], [0], [1], [0, 0, 1, 1], [], []>} : vector<8x32xf32>, vector<32x32xf32>, vector<8x32xf32> -> vector<8x32xf32>
    %c0_12 = arith.constant 0 : index
    %c0_13 = arith.constant 0 : index
    %12 = vector.load %arg6[%c0_12, %c0_13] : memref<32x32xf32, #tpu.memory_space<vmem>>, vector<32x32xf32>
    %cst_14 = arith.constant dense<0.000000e+00> : vector<8x32xf32>
    %13 = tpu.matmul %11, %12, %cst_14 {dimension_numbers = #tpu.dot_dimension_numbers<[1], [0], [0], [1], [0, 0, 1, 1], [], []>} : vector<8x32xf32>, vector<32x32xf32>, vector<8x32xf32> -> vector<8x32xf32>
    %14 = vector.extract_strided_slice %2 {offsets = [1, 0], sizes = [1, 32], strides = [1, 1]} : vector<3x32xf32> to vector<1x32xf32>
    %15 = vector.broadcast %14 : vector<1x32xf32> to vector<8x32xf32>
    %16 = arith.addf %13, %15 : vector<8x32xf32>
    %c0_15 = arith.constant 0 : index
    %c0_16 = arith.constant 0 : index
    %17 = vector.load %arg4[%c0_15, %c0_16] : memref<32x32xf32, #tpu.memory_space<vmem>>, vector<32x32xf32>
    %cst_17 = arith.constant dense<0.000000e+00> : vector<8x32xf32>
    %18 = tpu.matmul %1, %17, %cst_17 {dimension_numbers = #tpu.dot_dimension_numbers<[1], [0], [0], [1], [0, 0, 1, 1], [], []>} : vector<8x32xf32>, vector<32x32xf32>, vector<8x32xf32> -> vector<8x32xf32>
    %c0_18 = arith.constant 0 : index
    %c0_19 = arith.constant 0 : index
    %19 = vector.load %arg7[%c0_18, %c0_19] : memref<32x32xf32, #tpu.memory_space<vmem>>, vector<32x32xf32>
    %cst_20 = arith.constant dense<0.000000e+00> : vector<8x32xf32>
    %20 = tpu.matmul %18, %19, %cst_20 {dimension_numbers = #tpu.dot_dimension_numbers<[1], [0], [0], [1], [0, 0, 1, 1], [], []>} : vector<8x32xf32>, vector<32x32xf32>, vector<8x32xf32> -> vector<8x32xf32>
    %21 = vector.extract_strided_slice %2 {offsets = [2, 0], sizes = [1, 32], strides = [1, 1]} : vector<3x32xf32> to vector<1x32xf32>
    %22 = vector.broadcast %21 : vector<1x32xf32> to vector<8x32xf32>
    %23 = arith.addf %20, %22 : vector<8x32xf32>
    %c0_21 = arith.constant 0 : index
    %c0_22 = arith.constant 0 : index
    %24 = vector.load %arg9[%c0_21, %c0_22] : memref<32x32xf32, #tpu.memory_space<vmem>>, vector<32x32xf32>
    %cst_23 = arith.constant 0.000000e+00 : f32
    %25 = vector.broadcast %cst_23 : f32 to vector<8x32xf32>
    %26 = vector.extract_strided_slice %9 {offsets = [0, 0], sizes = [8, 16], strides = [1, 1]} : vector<8x32xf32> to vector<8x16xf32>
    %27 = vector.extract_strided_slice %16 {offsets = [0, 0], sizes = [8, 16], strides = [1, 1]} : vector<8x32xf32> to vector<8x16xf32>
    %28 = vector.extract_strided_slice %23 {offsets = [0, 0], sizes = [8, 16], strides = [1, 1]} : vector<8x32xf32> to vector<8x16xf32>
    %cst_24 = arith.constant dense<0.000000e+00> : vector<8x8xf32>
    %29 = tpu.matmul %26, %27, %cst_24 {dimension_numbers = #tpu.dot_dimension_numbers<[1], [1], [0], [0], [0, 0, 1, 0], [], []>} : vector<8x16xf32>, vector<8x16xf32>, vector<8x8xf32> -> vector<8x8xf32>
    %cst_25 = arith.constant 2.500000e-01 : f32
    %30 = vector.broadcast %cst_25 : f32 to vector<8x8xf32>
    %31 = arith.mulf %29, %30 : vector<8x8xf32>
    %cst_26 = arith.constant dense<0xFF800000> : vector<8xf32>
    %32 = vector.multi_reduction <maximumf>, %31, %cst_26 [1] : vector<8x8xf32> to vector<8xf32>
    %33 = vector.shape_cast %32 : vector<8xf32> to vector<8x1xf32>
    %34 = vector.broadcast %33 : vector<8x1xf32> to vector<8x8xf32>
    %35 = arith.subf %31, %34 : vector<8x8xf32>
    %36 = math.exp %35 : vector<8x8xf32>
    %cst_27 = arith.constant dense<0.000000e+00> : vector<8xf32>
    %37 = vector.multi_reduction <add>, %36, %cst_27 [1] : vector<8x8xf32> to vector<8xf32>
    %38 = vector.shape_cast %37 : vector<8xf32> to vector<8x1xf32>
    %39 = tpu.reciprocal %38 : vector<8x1xf32> -> vector<8x1xf32>
    %40 = vector.broadcast %39 : vector<8x1xf32> to vector<8x8xf32>
    %41 = arith.mulf %36, %40 : vector<8x8xf32>
    %cst_28 = arith.constant dense<0.000000e+00> : vector<8x16xf32>
    %42 = tpu.matmul %41, %28, %cst_28 {dimension_numbers = #tpu.dot_dimension_numbers<[1], [0], [0], [1], [0, 0, 1, 1], [], []>} : vector<8x8xf32>, vector<8x16xf32>, vector<8x16xf32> -> vector<8x16xf32>
    %43 = vector.extract_strided_slice %24 {offsets = [0, 0], sizes = [16, 32], strides = [1, 1]} : vector<32x32xf32> to vector<16x32xf32>
    %cst_29 = arith.constant dense<0.000000e+00> : vector<8x32xf32>
    %44 = tpu.matmul %42, %43, %cst_29 {dimension_numbers = #tpu.dot_dimension_numbers<[1], [0], [0], [1], [0, 0, 1, 1], [], []>} : vector<8x16xf32>, vector<16x32xf32>, vector<8x32xf32> -> vector<8x32xf32>
    %45 = arith.addf %25, %44 : vector<8x32xf32>
    %46 = vector.extract_strided_slice %9 {offsets = [0, 16], sizes = [8, 16], strides = [1, 1]} : vector<8x32xf32> to vector<8x16xf32>
    %47 = vector.extract_strided_slice %16 {offsets = [0, 16], sizes = [8, 16], strides = [1, 1]} : vector<8x32xf32> to vector<8x16xf32>
    %48 = vector.extract_strided_slice %23 {offsets = [0, 16], sizes = [8, 16], strides = [1, 1]} : vector<8x32xf32> to vector<8x16xf32>
    %cst_30 = arith.constant dense<0.000000e+00> : vector<8x8xf32>
    %49 = tpu.matmul %46, %47, %cst_30 {dimension_numbers = #tpu.dot_dimension_numbers<[1], [1], [0], [0], [0, 0, 1, 0], [], []>} : vector<8x16xf32>, vector<8x16xf32>, vector<8x8xf32> -> vector<8x8xf32>
    %cst_31 = arith.constant 2.500000e-01 : f32
    %50 = vector.broadcast %cst_31 : f32 to vector<8x8xf32>
    %51 = arith.mulf %49, %50 : vector<8x8xf32>
    %cst_32 = arith.constant dense<0xFF800000> : vector<8xf32>
    %52 = vector.multi_reduction <maximumf>, %51, %cst_32 [1] : vector<8x8xf32> to vector<8xf32>
    %53 = vector.shape_cast %52 : vector<8xf32> to vector<8x1xf32>
    %54 = vector.broadcast %53 : vector<8x1xf32> to vector<8x8xf32>
    %55 = arith.subf %51, %54 : vector<8x8xf32>
    %56 = math.exp %55 : vector<8x8xf32>
    %cst_33 = arith.constant dense<0.000000e+00> : vector<8xf32>
    %57 = vector.multi_reduction <add>, %56, %cst_33 [1] : vector<8x8xf32> to vector<8xf32>
    %58 = vector.shape_cast %57 : vector<8xf32> to vector<8x1xf32>
    %59 = tpu.reciprocal %58 : vector<8x1xf32> -> vector<8x1xf32>
    %60 = vector.broadcast %59 : vector<8x1xf32> to vector<8x8xf32>
    %61 = arith.mulf %56, %60 : vector<8x8xf32>
    %cst_34 = arith.constant dense<0.000000e+00> : vector<8x16xf32>
    %62 = tpu.matmul %61, %48, %cst_34 {dimension_numbers = #tpu.dot_dimension_numbers<[1], [0], [0], [1], [0, 0, 1, 1], [], []>} : vector<8x8xf32>, vector<8x16xf32>, vector<8x16xf32> -> vector<8x16xf32>
    %63 = vector.extract_strided_slice %24 {offsets = [16, 0], sizes = [16, 32], strides = [1, 1]} : vector<32x32xf32> to vector<16x32xf32>
    %cst_35 = arith.constant dense<0.000000e+00> : vector<8x32xf32>
    %64 = tpu.matmul %62, %63, %cst_35 {dimension_numbers = #tpu.dot_dimension_numbers<[1], [0], [0], [1], [0, 0, 1, 1], [], []>} : vector<8x16xf32>, vector<16x32xf32>, vector<8x32xf32> -> vector<8x32xf32>
    %65 = arith.addf %45, %64 : vector<8x32xf32>
    %c0_36 = arith.constant 0 : index
    %c0_37 = arith.constant 0 : index
    %66 = vector.load %arg10[%c0_36, %c0_37] : memref<1x32xf32, #tpu.memory_space<vmem>>, vector<1x32xf32>
    %67 = vector.broadcast %66 : vector<1x32xf32> to vector<8x32xf32>
    %68 = arith.addf %65, %67 : vector<8x32xf32>
    %69 = arith.addf %68, %1 : vector<8x32xf32>
    %c0_38 = arith.constant 0 : index
    %c0_39 = arith.constant 0 : index
    %70 = vector.load %arg11[%c0_38, %c0_39] : memref<32x32xf32, #tpu.memory_space<vmem>>, vector<32x32xf32>
    %cst_40 = arith.constant dense<0.000000e+00> : vector<8x32xf32>
    %71 = tpu.matmul %69, %70, %cst_40 {dimension_numbers = #tpu.dot_dimension_numbers<[1], [0], [0], [1], [0, 0, 1, 1], [], []>} : vector<8x32xf32>, vector<32x32xf32>, vector<8x32xf32> -> vector<8x32xf32>
    %c0_41 = arith.constant 0 : index
    %c0_42 = arith.constant 0 : index
    %72 = vector.load %arg12[%c0_41, %c0_42] : memref<32x32xf32, #tpu.memory_space<vmem>>, vector<32x32xf32>
    %cst_43 = arith.constant dense<0.000000e+00> : vector<8x32xf32>
    %73 = tpu.matmul %71, %72, %cst_43 {dimension_numbers = #tpu.dot_dimension_numbers<[1], [0], [0], [1], [0, 0, 1, 1], [], []>} : vector<8x32xf32>, vector<32x32xf32>, vector<8x32xf32> -> vector<8x32xf32>
    %74 = arith.addf %73, %69 : vector<8x32xf32>
    %c0_44 = arith.constant 0 : index
    %c0_45 = arith.constant 0 : index
    %c0_46 = arith.constant 0 : index
    %75 = vector.load %arg13[%c0_44, %c0_45, %c0_46] : memref<1x8x32xf32, #tpu.memory_space<vmem>>, vector<1x8x32xf32>
    %76 = vector.shape_cast %75 : vector<1x8x32xf32> to vector<8x32xf32>
    %77 = vector.shape_cast %74 : vector<8x32xf32> to vector<1x8x32xf32>
    tpu.vector_store %arg13[%c0_44, %c0_45, %c0_46], %77 {strides = array<i32>} : memref<1x8x32xf32, #tpu.memory_space<vmem>>, vector<1x8x32xf32>,
    return
  }
  func.func @transform_0(%arg0: i32) -> (i32, i32, i32) {
    %c0_i32 = arith.constant 0 : i32
    %c0_i32_0 = arith.constant 0 : i32
    %c0_i32_1 = arith.constant 0 : i32
    return %arg0, %c0_i32, %c0_i32_0 : i32, i32, i32
  }
  func.func @transform_1(%arg0: i32) -> (i32, i32) {
    %c0_i32 = arith.constant 0 : i32
    %c0_i32_0 = arith.constant 0 : i32
    %c0_i32_1 = arith.constant 0 : i32
    return %c0_i32, %c0_i32_0 : i32, i32
  }
  func.func @transform_2(%arg0: i32) -> (i32, i32) {
    %c0_i32 = arith.constant 0 : i32
    %c0_i32_0 = arith.constant 0 : i32
    %c0_i32_1 = arith.constant 0 : i32
    return %c0_i32, %c0_i32_0 : i32, i32
  }
  func.func @transform_3(%arg0: i32) -> (i32, i32) {
    %c0_i32 = arith.constant 0 : i32
    %c0_i32_0 = arith.constant 0 : i32
    %c0_i32_1 = arith.constant 0 : i32
    return %c0_i32, %c0_i32_0 : i32, i32
  }
  func.func @transform_4(%arg0: i32) -> (i32, i32) {
    %c0_i32 = arith.constant 0 : i32
    %c0_i32_0 = arith.constant 0 : i32
    %c0_i32_1 = arith.constant 0 : i32
    return %c0_i32, %c0_i32_0 : i32, i32
  }
  func.func @transform_5(%arg0: i32) -> (i32, i32) {
    %c0_i32 = arith.constant 0 : i32
    %c0_i32_0 = arith.constant 0 : i32
    %c0_i32_1 = arith.constant 0 : i32
    return %c0_i32, %c0_i32_0 : i32, i32
  }
  func.func @transform_6(%arg0: i32) -> (i32, i32) {
    %c0_i32 = arith.constant 0 : i32
    %c0_i32_0 = arith.constant 0 : i32
    %c0_i32_1 = arith.constant 0 : i32
    return %c0_i32, %c0_i32_0 : i32, i32
  }
  func.func @transform_7(%arg0: i32) -> (i32, i32) {
    %c0_i32 = arith.constant 0 : i32
    %c0_i32_0 = arith.constant 0 : i32
    %c0_i32_1 = arith.constant 0 : i32
    return %c0_i32, %c0_i32_0 : i32, i32
  }
  func.func @transform_8(%arg0: i32) -> (i32, i32) {
    %c0_i32 = arith.constant 0 : i32
    %c0_i32_0 = arith.constant 0 : i32
    %c0_i32_1 = arith.constant 0 : i32
    return %c0_i32, %c0_i32_0 : i32, i32
  }
  func.func @transform_9(%arg0: i32) -> (i32, i32) {
    %c0_i32 = arith.constant 0 : i32
    %c0_i32_0 = arith.constant 0 : i32
    %c0_i32_1 = arith.constant 0 : i32
    return %c0_i32, %c0_i32_0 : i32, i32
  }
  func.func @transform_10(%arg0: i32) -> (i32, i32) {
    %c0_i32 = arith.constant 0 : i32
    %c0_i32_0 = arith.constant 0 : i32
    %c0_i32_1 = arith.constant 0 : i32
    return %c0_i32, %c0_i32_0 : i32, i32
  }
  func.func @transform_11(%arg0: i32) -> (i32, i32) {
    %c0_i32 = arith.constant 0 : i32
    %c0_i32_0 = arith.constant 0 : i32
    %c0_i32_1 = arith.constant 0 : i32
    return %c0_i32, %c0_i32_0 : i32, i32
  }
  func.func @transform_12(%arg0: i32) -> (i32, i32, i32) {
    %c0_i32 = arith.constant 0 : i32
    %c0_i32_0 = arith.constant 0 : i32
    %c0_i32_1 = arith.constant 0 : i32
    return %arg0, %c0_i32, %c0_i32_0 : i32, i32, i32
  }
}

</mosaic_0001>

<bundles_post_ra>
// kernel: tpu_custom_call.1
= control target key start
LH: loop header
LB: loop body
LE: loop exit
PB: predicated region body
PF: predicated region fallthrough
CT: control target
= control target key end

     0   :  { %s3040_s0 = inlined_call_operand.hbm [shape: f32[2,8,32], index: 0, kind: input, shape index: {}]   ;;  %s3041_s1 = inlined_call_operand.hbm [shape: f32[32,32], index: 1, kind: input, shape index: {}]   ;;  %s3042_s2 = inlined_call_operand.hbm [shape: f32[32,32], index: 2, kind: input, shape index: {}]   ;;  %s3043_s3 = inlined_call_operand.hbm [shape: f32[32,32], index: 3, kind: input, shape index: {}]   ;;  %s3044_s4 = inlined_call_operand.hbm [shape: f32[32,32], index: 4, kind: input, shape index: {}]   ;;  %s3045_s5 = inlined_call_operand.hbm [shape: f32[32,32], index: 5, kind: input, shape index: {}]   ;;  %s3046_s6 = inlined_call_operand.hbm [shape: f32[32,32], index: 6, kind: input, shape index: {}]   ;;  %s3047_s7 = inlined_call_operand.vmem [shape: f32[3,32], index: 7, kind: input, shape index: {}]   ;;  %s3048_s8 = inlined_call_operand.hbm [shape: f32[32,32], index: 8, kind: input, shape index: {}]   ;;  %s3049_s9 = inlined_call_operand.vmem [shape: f32[1,32], index: 9, kind: input, shape index: {}]   ;;  %s3050_s10 = inlined_call_operand.hbm [shape: f32[32,32], index: 10, kind: input, shape index: {}]   ;;  %s3051_s11 = inlined_call_operand.hbm [shape: f32[32,32], index: 11, kind: input, shape index: {}]   ;;  %s3052_s12 = inlined_call_operand.hbm [shape: f32[2,8,32], index: 12, kind: output, shape index: {}]  }
   0x1   :  { %3057 = sst [smem:[#allocation27_spill]] %s3041_s1 }
   0x2   :  { %3058 = sst [smem:[#allocation28_spill]] %s3042_s2 }
   0x3   :  { %3059 = sst [smem:[#allocation29_spill]] %s3043_s3 }
   0x4   :  { %3060 = sst [smem:[#allocation30_spill]] %s3044_s4 }
   0x5   :  { %3061 = sst [smem:[#allocation31_spill]] %s3045_s5 }
   0x6   :  { %3062 = sst [smem:[#allocation32_spill]] %s3046_s6 }
   0x7   :  { %3063 = sst [smem:[#allocation33_spill]] %s3048_s8 }
   0x8   :  { %17 = vsyncpa [#allocation3], 0 }
   0x9   :  { %19 = vsyncpa [#allocation3 + $0x1], 0 }
   0xa   :  { %20 = vsyncpa [#allocation6], 0 }
   0xb   :  { %21 = vsyncpa [#allocation9], 0 }
   0xc   :  { %22 = vsyncpa [#allocation12], 0 }
   0xd   :  { %23 = vsyncpa [#allocation15], 0 }
   0xe   :  { %24 = vsyncpa [#allocation18], 0 }
   0xf   :  { %25 = vsyncpa [#allocation4], 0 }
  0x10   :  { %27 = vsyncpa [#allocation4 + $0x1], 0  ;;  %s2647_s21 = smov 0   ;;  %s2649_s22 = smov 0  }
  0x11   :  { %s2651_s23 = smov 0   ;;  %s2653_s24 = smov 0  }
  0x12 LB: > { %s2566_s25 = smov [#allocation5]   ;;  %s2668_s27 = sadd.s32 4294967295, %s2564_s24   ;;  %s2564_s24 = sphi %s2653_s24, %s3096_s24   ;;  %s2560_s23 = sphi %s2651_s23, %s3095_s23   ;;  %s2556_s22 = sphi %s2649_s22, %s3094_s22   ;;  %s2552_s21 = sphi %s2647_s21, %s3093_s21  }
  0x13   : > { %s333_s26 = sshll.u32 %s2566_s25, 4  ;;  %p1846_p0 = scmp.ge.s32.totalorder %s2564_s24, 1  ;;  %s334_s26 = int_to_ptr.vmem [resolvable:$true] %s333_s26 }
  0x14   : > { %p3053_p1 = scmp.eq.s32.totalorder %s2668_s27, 0  ;;  %p321_p2 = scmp.lt.s32.totalorder %s2564_s24, 3 }
  0x15   : > { %s2567_s29 = smov [#allocation8]   ;;  %s2568_s14 = smov [#allocation11]  }
  0x16   : > { %p2673_p3 = pnand %p1846_p0, %p321_p2  ;;  %s359_s30 = sshll.u32 %s2567_s29, 4  ;;  %s2686_s30 = int_to_ptr.vmem [resolvable:$true] %s359_s30 }
  0x17   : > { %s385_s15 = sshll.u32 %s2568_s14, 4  ;;  %s2229_s17 = scalar_lea.vmem %s334_s26, 512  ;;  %s2688_s15 = int_to_ptr.vmem [resolvable:$true] %s385_s15 }
  0x18   : > { %s3064_s28 = scalar_select %p2673_p3, 1, 0 }
  0x19   : > { %p2108_p5 = pneg %p2673_p3  ;;  %p2230_p8 = scmp.ne.s32.totalorder %s334_s26, %s2229_s17 }
  0x1a   : > { %p2237_p11 = scmp.lt.s32.totalorder %s334_s26, %s334_s26  ;;  %p2238_p12 = scmp.lt.s32.totalorder %s2229_s17, %s2229_s17 }
  0x1b   : > { %p2682_p6 = pnand %p2108_p5, %p3053_p1 }
  0x1c   : > { %p2239_p13 = por %p2238_p12, %p2237_p11 }
  0x1d   : > { %p2692_p7 = pneg %p2682_p6 }
  0x1f   : > { %p2232_p9 = pnand %p2230_p8, %p2692_p7 }
  0x21   : > { %p2233_p10 = pneg %p2232_p9 }
  0x23   : > { %p2240_p0 = pnand %p2239_p13, %p2233_p10 }
  0x25   : > { %2243 = shalt.err (!%p2240_p0)
}
  0x26   : > { %s2569_s18 = smov 128   ;;  %s2570_s19 = smov 8  }
  0x27   : > { %s3067_s1 = sld [smem:[#allocation27_spill]]  ;;  %s2255_s29 = scalar_lea.vmem %s2686_s30, 512 }
  0x28   : > { %p2256_p2 = scmp.ne.s32.totalorder %s2686_s30, %s2255_s29  ;;  %p2263_p9 = scmp.lt.s32.totalorder %s2686_s30, %s2686_s30 }
  0x29   : > { %p2264_p10 = scmp.lt.s32.totalorder %s2255_s29, %s2255_s29 }
  0x2a   : > { %p2258_p5 = pnand %p2256_p2, %p2692_p7 }
  0x2b   : > { %p2265_p11 = por %p2264_p10, %p2263_p9 }
  0x2c   : > { %p2259_p8 = pneg %p2258_p5 }
  0x2d   : > { %2111 = dma.hbm_to_vmem [thread:$0]  (!%p2682_p6), %s3067_s1, 512, %s334_s26, [#allocation6], %s2569_s18, %s2569_s18, %s2570_s19  }
  0x2e   : > { %p2266_p12 = pnand %p2265_p11, %p2259_p8 }
  0x30   : > { %2269 = shalt.err (!%p2266_p12)
}
  0x31   : > { %s3068_s3 = sld [smem:[#allocation29_spill]]  ;;  %s2281_s26 = scalar_lea.vmem %s2688_s15, 512 }
  0x32   : > { %p2282_p13 = scmp.ne.s32.totalorder %s2688_s15, %s2281_s26  ;;  %p2289_p5 = scmp.lt.s32.totalorder %s2688_s15, %s2688_s15 }
  0x33   : > { %p2290_p8 = scmp.lt.s32.totalorder %s2281_s26, %s2281_s26 }
  0x34   : > { %p2284_p0 = pnand %p2282_p13, %p2692_p7 }
  0x35   : > { %p2291_p9 = por %p2290_p8, %p2289_p5 }
  0x36   : > { %p2285_p2 = pneg %p2284_p0 }
  0x37   : > { %2117 = dma.hbm_to_vmem [thread:$0]  (!%p2682_p6), %s3068_s3, 512, %s2686_s30, [#allocation9], %s2569_s18, %s2569_s18, %s2570_s19  }
  0x38   : > { %p2292_p10 = pnand %p2291_p9, %p2285_p2 }
  0x3a   : > { %2295 = shalt.err (!%p2292_p10)
}
  0x3b   : > { %s3069_s5 = sld [smem:[#allocation31_spill]]  ;;  %s2571_s30 = smov [#allocation14]  }
  0x3c   : > { %s414_s29 = sshll.u32 %s2571_s30, 4  ;;  %s2572_s14 = smov [#allocation7]   ;;  %s415_s29 = int_to_ptr.vmem [resolvable:$true] %s414_s29 }
  0x3d   : > { %s346_s17 = sshll.u32 %s2572_s14, 4  ;;  %s2307_s26 = scalar_lea.vmem %s415_s29, 512  ;;  %s347_s17 = int_to_ptr.vmem [resolvable:$true] %s346_s17 }
  0x3e   : > { %p2308_p11 = scmp.ne.s32.totalorder %s415_s29, %s2307_s26  ;;  %p2315_p0 = scmp.lt.s32.totalorder %s415_s29, %s415_s29 }
  0x3f   : > { %p2316_p2 = scmp.lt.s32.totalorder %s2307_s26, %s2307_s26 }
  0x40   : > { %p2310_p12 = pnand %p2308_p11, %p2692_p7 }
  0x41   : > { %2123 = dma.hbm_to_vmem [thread:$0]  (!%p2682_p6), %s3069_s5, 512, %s2688_s15, [#allocation12], %s2569_s18, %s2569_s18, %s2570_s19  }
  0x42   : > { %p2311_p13 = pneg %p2310_p12  ;;  %p2317_p5 = por %p2316_p2, %p2315_p0 }
  0x44   : > { %p2318_p8 = pnand %p2317_p5, %p2311_p13 }
  0x46   : > { %2321 = shalt.err (!%p2318_p8)
}
  0x47   : > { %s3070_s8 = sld [smem:[#allocation33_spill]]  ;;  %s2333_s25 = scalar_lea.vmem %s347_s17, 512 }
  0x48   : > { %p2334_p9 = scmp.ne.s32.totalorder %s347_s17, %s2333_s25  ;;  %p2341_p12 = scmp.lt.s32.totalorder %s347_s17, %s347_s17 }
  0x49   : > { %p2342_p0 = scmp.lt.s32.totalorder %s2333_s25, %s2333_s25 }
  0x4a   : > { %p2336_p10 = pnand %p2334_p9, %p2692_p7 }
  0x4b   : > { %p2343_p13 = por %p2342_p0, %p2341_p12 }
  0x4c   : > { %p2337_p11 = pneg %p2336_p10 }
  0x4d   : > { %2129 = dma.hbm_to_vmem [thread:$0]  (!%p2682_p6), %s3070_s8, 512, %s415_s29, [#allocation15], %s2569_s18, %s2569_s18, %s2570_s19  }
  0x4e   : > { %p2344_p2 = pnand %p2343_p13, %p2337_p11 }
  0x50   : > { %2347 = shalt.err (!%p2344_p2)
}
  0x51   : > { %s3071_s2 = sld [smem:[#allocation28_spill]]  ;;  %s2573_s29 = smov [#allocation10]  }
  0x52   : > { %s372_s26 = sshll.u32 %s2573_s29, 4  ;;  %s2574_s15 = smov [#allocation13]   ;;  %s373_s26 = int_to_ptr.vmem [resolvable:$true] %s372_s26 }
  0x53   : > { %s398_s20 = sshll.u32 %s2574_s15, 4  ;;  %s2359_s1 = scalar_lea.vmem %s373_s26, 512  ;;  %s399_s20 = int_to_ptr.vmem [resolvable:$true] %s398_s20 }
  0x54   : > { %p2360_p5 = scmp.ne.s32.totalorder %s373_s26, %s2359_s1  ;;  %p2367_p10 = scmp.lt.s32.totalorder %s373_s26, %s373_s26 }
  0x55   : > { %p2368_p11 = scmp.lt.s32.totalorder %s2359_s1, %s2359_s1 }
  0x56   : > { %p2362_p8 = pnand %p2360_p5, %p2692_p7 }
  0x57   : > { %2114 = dma.hbm_to_vmem [thread:$0]  (!%p2682_p6), %s3071_s2, 512, %s347_s17, [#allocation6], %s2569_s18, %s2569_s18, %s2570_s19  }
  0x58   : > { %p2363_p9 = pneg %p2362_p8  ;;  %p2369_p12 = por %p2368_p11, %p2367_p10 }
  0x5a   : > { %p2370_p0 = pnand %p2369_p12, %p2363_p9 }
  0x5c   : > { %2373 = shalt.err (!%p2370_p0)
}
  0x5d   : > { %s3072_s4 = sld [smem:[#allocation30_spill]]  ;;  %s2385_s30 = scalar_lea.vmem %s399_s20, 512 }
  0x5e   : > { %p2386_p13 = scmp.ne.s32.totalorder %s399_s20, %s2385_s30  ;;  %p2393_p8 = scmp.lt.s32.totalorder %s399_s20, %s399_s20 }
  0x5f   : > { %p2394_p10 = scmp.lt.s32.totalorder %s2385_s30, %s2385_s30 }
  0x60   : > { %p2388_p2 = pnand %p2386_p13, %p2692_p7 }
  0x61   : > { %p2395_p9 = por %p2394_p10, %p2393_p8 }
  0x62   : > { %p2389_p5 = pneg %p2388_p2 }
  0x63   : > { %2120 = dma.hbm_to_vmem [thread:$0]  (!%p2682_p6), %s3072_s4, 512, %s373_s26, [#allocation9], %s2569_s18, %s2569_s18, %s2570_s19  }
  0x64   : > { %p2396_p11 = pnand %p2395_p9, %p2389_p5 }
  0x66   : > { %2399 = shalt.err (!%p2396_p11)
}
  0x67   : > { %s3073_s6 = sld [smem:[#allocation32_spill]]  ;;  %s2575_s29 = smov [#allocation16]  }
  0x68   : > { %s430_s26 = sshll.u32 %s2575_s29, 4  ;;  %s2576_s15 = smov [#allocation17]   ;;  %s431_s26 = int_to_ptr.vmem [resolvable:$true] %s430_s26 }
  0x69   : > { %s443_s17 = sshll.u32 %s2576_s15, 4  ;;  %s2411_s25 = scalar_lea.vmem %s431_s26, 512  ;;  %s444_s17 = int_to_ptr.vmem [resolvable:$true] %s443_s17 }
  0x6a   : > { %p2412_p12 = scmp.ne.s32.totalorder %s431_s26, %s2411_s25  ;;  %p2419_p2 = scmp.lt.s32.totalorder %s431_s26, %s431_s26 }
  0x6b   : > { %p2420_p5 = scmp.lt.s32.totalorder %s2411_s25, %s2411_s25 }
  0x6c   : > { %p2414_p0 = pnand %p2412_p12, %p2692_p7 }
  0x6d   : > { %2126 = dma.hbm_to_vmem [thread:$0]  (!%p2682_p6), %s3073_s6, 512, %s399_s20, [#allocation12], %s2569_s18, %s2569_s18, %s2570_s19  }
  0x6e   : > { %p2415_p13 = pneg %p2414_p0  ;;  %p2421_p8 = por %p2420_p5, %p2419_p2 }
  0x70   : > { %p2422_p10 = pnand %p2421_p8, %p2415_p13 }
  0x72   : > { %2425 = shalt.err (!%p2422_p10)
}
  0x73   : > { %2132 = dma.hbm_to_vmem [thread:$0]  (!%p2682_p6), %s3050_s10, 512, %s431_s26, [#allocation15], %s2569_s18, %s2569_s18, %s2570_s19  }
  0x74   : > { %s2437_s1 = scalar_lea.vmem %s444_s17, 512  ;;  %p2445_p0 = scmp.lt.s32.totalorder %s444_s17, %s444_s17 }
  0x75   : > { %p2438_p9 = scmp.ne.s32.totalorder %s444_s17, %s2437_s1  ;;  %p2446_p2 = scmp.lt.s32.totalorder %s2437_s1, %s2437_s1 }
  0x77   : > { %p2440_p11 = pnand %p2438_p9, %p2692_p7  ;;  %p2447_p13 = por %p2446_p2, %p2445_p0 }
  0x79   : > { %p2441_p12 = pneg %p2440_p11 }
  0x7b   : > { %p2448_p5 = pnand %p2447_p13, %p2441_p12 }
  0x7d   : > { %2451 = shalt.err (!%p2448_p5)
}
  0x7e   : > { %2135 = dma.hbm_to_vmem [thread:$0]  (!%p2682_p6), %s3051_s11, 512, %s444_s17, [#allocation18], %s2569_s18, %s2569_s18, %s2570_s19  }
  0x7f   : > { %s1845_s13 = sadd.s32 4294967294, %s2564_s24   ;;  %s2798_s16 = sadd.s32 1, %s2564_s24  }
  0x80   : > { %s40_s26 = sadd.s32 1, %s2560_s23  ;;  %s37_s15 = ssub.s32 %s2564_s24, %s2798_s16 }
  0x81   : > { %p47_p7 = scmp.ne.s32.totalorder %s2560_s23, %s2556_s22  ;;  %p38_p8 = scmp.eq.s32.totalorder %s37_s15, 0 }
  0x82   : > { %p48_p10 = scmp.eq.s32.totalorder %s2564_s24, 0  ;;  %p53_p9 = scmp.ne.s32.totalorder %s2556_s22, %s2552_s21 }
  0x83   : > { %p308_p11 = scmp.eq.s32.totalorder %s2668_s27, 1  ;;  %p314_p2 = scmp.eq.s32.totalorder %s1845_s13, 1 }
  0x84   : > { %s2810_s25 = scalar_select %p38_p8, %s2560_s23, %s40_s26  }
  0x85   : > { %p49_p12 = por %p48_p10, %p47_p7  ;;  %p2814_p0 = por %p3053_p1, %p53_p9 }
  0x86   : > { %p2818_p6 = por %p308_p11, %p47_p7  ;;  %p2153_p13 = scmp.lt.s32.totalorder %s2564_s24, 2 }
  0x87   : > { %s3074_s20 = scalar_select %p2814_p0, 1, 0 }
  0x88   : > { %s3075_s18 = scalar_select %p2818_p6, 1, 0 }
  0x89   : > { %s457_s19 = sand.u32 1, %s2560_s23   ;;  %p2824_p5 = por %p314_p2, %p53_p9 }
  0x8a   : > { %s1857_s30 = sshll.u32 %s457_s19, 3  ;;  %s1858_s1 = sshll.u32 %s2564_s24, 7 }
  0x8b   : > { %s3076_s17 = scalar_select %p2824_p5, 1, 0 }
  0x8c   : > { %s2832_s26 = scalar_lea.hbm %s3040_s0, %s1858_s1  ;;  %s461_s15 = scalar_lea.vmem [#allocation2], %s1857_s30 }
  0x8d   : > { %s468_s2 = sshll.u32 %s461_s15, 4  ;;  %p2834_p7 = pnand %p2153_p13, %p49_p12  ;;  %s469_s2 = int_to_ptr.vmem [resolvable:$true] %s468_s2 }
  0x8e   : > { %s458_s3 = scalar_lea.sflag [#allocation3], %s457_s19  ;;  %s2452_s4 = scalar_lea.hbm %s2832_s26, 128 }
  0x8f   : > { %p2453_p8 = scmp.ne.s32.totalorder %s2832_s26, %s2452_s4  ;;  %p2454_p10 = pneg %p2834_p7 }
  0x90   : > { %s2457_s29 = scalar_lea.hbm %s3040_s0, 256  ;;  %p2458_p12 = scmp.lt.s32.totalorder %s2832_s26, %s3040_s0 }
  0x91   : > { %p2455_p9 = pnand %p2454_p10, %p2453_p8  ;;  %p2459_p2 = scmp.lt.s32.totalorder %s2457_s29, %s2452_s4 }
  0x93   : > { %p2456_p11 = pneg %p2455_p9  ;;  %p2460_p13 = por %p2459_p2, %p2458_p12 }
  0x95   : > { %p2461_p4 = pnand %p2460_p13, %p2456_p11 }
  0x97   : > { %2464 = shalt.err (!%p2461_p4)
}
  0x98   : > { %s2465_s15 = scalar_lea.vmem %s469_s2, 128  ;;  %s2577_s19 = smov [#allocation2]  }
  0x99   : > { %p2466_p1 = scmp.ne.s32.totalorder %s469_s2, %s2465_s15  ;;  %s2470_s6 = sshll.u32 %s2577_s19, 4  ;;  %s2471_s6 = int_to_ptr.vmem [resolvable:$false] %s2470_s6 }
  0x9a   : > { %s2472_s8 = scalar_lea.vmem %s2471_s6, 256  ;;  %p2473_p8 = scmp.lt.s32.totalorder %s469_s2, %s2471_s6 }
  0x9b   : > { %p2468_p5 = pnand %p2466_p1, %p2454_p10  ;;  %p2474_p9 = scmp.lt.s32.totalorder %s2472_s8, %s2465_s15 }
  0x9d   : > { %p2469_p6 = pneg %p2468_p5  ;;  %p2475_p0 = por %p2474_p9, %p2473_p8 }
  0x9f   : > { %p2476_p3 = pnand %p2475_p0, %p2469_p6 }
  0xa1   : > { %2479 = shalt.err (!%p2476_p3)
}
  0xa2   : > { %2139 = dma.hbm_to_vmem [thread:$0]  (!%p2834_p7), %s2832_s26, 128, %s469_s2, %s458_s3  }
  0xa3   : > { %p3078_p11 = scmp.ne.s32.totalorder %s3064_s28, 0 }
  0xa4   : > { %s2855_s4 = sand.u32 (!%p3078_p11), 1, %s2556_s22   ;;  %p3079_p1 = scmp.ne.s32.totalorder (!%p3078_p11), %s3074_s20, 0 }
  0xa5   : > { %477 = sbr.rel (%p3078_p11) target bundleno = 2011 (0x7db), region = 68  ;;  %s1860_s5 = sshll.u32 (!%p3078_p11), %s2855_s4, 3 }
  0xa6   : > { %s480_s6 = scalar_lea.sflag (!%p3078_p11), [#allocation3], %s2855_s4  ;;  %s2861_s8 = scalar_lea.vmem (!%p3078_p11), [#allocation2], %s1860_s5 }
  0xaa   : > { %2523 = dma.done.wait (%p3079_p1), %s480_s6, 128  }
  0xab   : > { %2525 = vsyncadd (%p3079_p1), %s480_s6, 4294967168  ;;  %p3080_p3 = scmp.eq.s32.totalorder %s2668_s27, 0 }
  0xad   : > { %2527 = dma.done.wait (%p3080_p3), [#allocation6], 1024   ;;  %p3081_p4 = pmov %p3080_p3 }
  0xae   : > { %p3082_p0 = pmov %p3080_p3 }
  0xaf   : > { %2529 = vsyncadd (%p3081_p4), [#allocation6], 4294966272 }
  0xb0   : > { %2531 = dma.done.wait (%p3082_p0), [#allocation9], 1024   ;;  %p3083_p6 = pmov %p3082_p0 }
  0xb1   : > { %p3084_p5 = pmov %p3082_p0 }
  0xb2   : > { %2533 = vsyncadd (%p3083_p6), [#allocation9], 4294966272 }
  0xb3   : > { %2535 = dma.done.wait (%p3084_p5), [#allocation12], 1024   ;;  %p3085_p7 = pmov %p3082_p0 }
  0xb4   : > { %p3086_p10 = pmov %p3082_p0 }
  0xb5   : > { %2537 = vsyncadd (%p3085_p7), [#allocation12], 4294966272 }
  0xb6   : > { %2539 = dma.done.wait (%p3086_p10), [#allocation15], 1024   ;;  %p3087_p12 = pmov %p3082_p0 }
  0xb7   : > { %p3088_p2 = pmov %p3082_p0 }
  0xb8   : > { %2541 = vsyncadd (%p3087_p12), [#allocation15], 4294966272 }
  0xb9   : > { %2543 = dma.done.wait (%p3088_p2), [#allocation18], 512   ;;  %p3089_p13 = pmov %p3082_p0 }
  0xba   : > { %v2578_v0 = vmov 0.0   ;;  %vm2579_vm0 = vmmov 0   ;;  %v565_v1 = vld [vmem:[#allocation5 + $0x18] sm:$0xff]  ;;  %v564_v2 = vld [vmem:[#allocation5 + $0x10] sm:$0xff]  ;;  %v563_v3 = vld [vmem:[#allocation5 + $0x8] sm:$0xff]  ;;  %vm566_vm1 = vcmask 261120   ;;  %v644_v26 = vlaneseq }
  0xbb   : > { %2545 = vsyncadd (%p3089_p13), [#allocation18], 4294966784  ;;  %1946 = vmatprep.subr.mxu0 %v2578_v0  ;;  %1954 = vmatprep.mubr.msk.f32.mxu0 %vm2579_vm0, %v2578_v0  ;;  %v643_v4 = vld [vmem:[#allocation10 + $0x18] sm:$0xff]  ;;  %v642_v5 = vld [vmem:[#allocation10 + $0x10] sm:$0xff]  ;;  %vm1035_vm2 = vcmask 130048   ;;  %s2580_s28 = smov 112  }
  0xbc   : > { %1957 = vmatprep.subr.mxu1 %v2578_v0  ;;  %1965 = vmatprep.mubr.msk.f32.mxu1 %vm2579_vm0, %v2578_v0  ;;  %v562_v6 = vld [vmem:[#allocation5] sm:$0xff]  ;;  %v2896_v7 = vld [vmem:[%s2861_s8] sm:$0xff]  ;;  %v641_v9 = vld [vmem:[#allocation10 + $0x8] sm:$0xff]  ;;  %v2934_v27 = vshrl.u32 %v644_v26, 7  ;;  %vm1113_vm3 = vcmask 64512   ;;  %s1889_s13 = sshll.u32 %s2668_s27, 7 }
  0xbd   : > { %1947 = vmatpush3.msra.mxu0 %v565_v1  ;;  %1958 = vmatpush3.msra.mxu1 %v643_v4  ;;  %v724_v8 = vld [vmem:[#allocation7 + $0x18] sm:$0xff]  ;;  %v723_v10 = vld [vmem:[#allocation7 + $0x10] sm:$0xff]  ;;  %v722_v11 = vld [vmem:[#allocation7 + $0x8] sm:$0xff]  ;;  %s559_s1 = scalar_lea.vmem [#allocation19], %s1860_s5  ;;  %s3002_s15 = scalar_lea.hbm %s3052_s12, %s1889_s13 }
  0xbe   : > { %1948 = vmatprep.subr.mxu0 %v2578_v0  ;;  %1959 = vmatprep.subr.mxu1 %v2578_v0  ;;  %v721_v12 = vld [vmem:[#allocation7] sm:$0xff]  ;;  %v798_v14 = vld [vmem:[#allocation11 + $0x18] sm:$0xff]  ;;  %v797_v16 = vld [vmem:[#allocation11 + $0x10] sm:$0xff]  ;;  %v801_v29 = vsub.s32 1, %v2934_v27  ;;  %v646_v32 = vsub.s32 0, %v2934_v27  ;;  %v956_v60 = vsub.s32 2, %v2934_v27 }
  0xbf   : > { %1949 = vmatpush3.msra.mxu0 %v564_v2  ;;  %1960 = vmatpush3.msra.mxu1 %v642_v5  ;;  %v640_v13 = vld [vmem:[#allocation10] sm:$0xff]  ;;  %v796_v18 = vld [vmem:[#allocation11 + $0x8] sm:$0xff]  ;;  %v879_v22 = vld [vmem:[#allocation8 + $0x18] sm:$0xff]  ;;  %s1689_s14 = sshll.u32 %s559_s1, 4  ;;  %s1676_s19 = scalar_lea.sflag [#allocation4], %s2855_s4  ;;  %s1690_s14 = int_to_ptr.vmem [resolvable:$true] %s1689_s14 }
  0xc0   : > { %1950 = vmatprep.subr.mxu0 %v2578_v0  ;;  %1961 = vmatprep.subr.mxu1 %v2578_v0  ;;  %v795_v19 = vld [vmem:[#allocation11] sm:$0xff]  ;;  %v878_v23 = vld [vmem:[#allocation8 + $0x10] sm:$0xff]  ;;  %v877_v24 = vld [vmem:[#allocation8 + $0x8] sm:$0xff]  ;;  %s2480_s6 = scalar_lea.vmem %s1690_s14, 128  ;;  %p3090_p9 = scmp.ne.s32.totalorder %s3075_s18, 0 }
  0xc1   : > { %1951 = vmatpush3.msra.mxu0 %v563_v3  ;;  %1962 = vmatpush3.msra.mxu1 %v641_v9  ;;  %v876_v25 = vld [vmem:[#allocation8] sm:$0xff]  ;;  %v561_v31 = vld [vmem:[%s3047_s7] sm:$0x7]  ;;  %v953_v41 = vld [vmem:[#allocation13 + $0x18] sm:$0xff]  ;;  %p2481_p8 = scmp.ne.s32.totalorder %s1690_s14, %s2480_s6  ;;  %s2581_s27 = smov [#allocation19]  }
  0xc2   : > { %1952 = vmatprep.subr.mxu0 %v2578_v0  ;;  %1963 = vmatprep.subr.mxu1 %v2578_v0  ;;  %v802_v33 = vrot.slane %v561_v31, %v801_v29  ;;  %v647_v34 = vrot.slane %v561_v31, %v646_v32  ;;  %v952_v42 = vld [vmem:[#allocation13 + $0x10] sm:$0xff]  ;;  %v951_v43 = vld [vmem:[#allocation13 + $0x8] sm:$0xff]  ;;  %v950_v44 = vld [vmem:[#allocation13] sm:$0xff]  ;;  %v957_v62 = vrot.slane %v561_v31, %v956_v60  ;;  %s2484_s5 = sshll.u32 %s2581_s27, 4  ;;  %s2485_s5 = int_to_ptr.vmem [resolvable:$false] %s2484_s5 }
  0xc3   : > { %1953 = vmatpush3.msra.mxu0 %v562_v6  ;;  %1964 = vmatpush3.msra.mxu1 %v640_v13  ;;  %v1520_v26 = vld [vmem:[#allocation16] sm:$0xff]  ;;  %v1600_v27 = vld [vmem:[#allocation17 + $0x18] sm:$0xff]  ;;  %v1598_v29 = vld [vmem:[#allocation17 + $0x8] sm:$0xff]  ;;  %p2482_p11 = pnand %p2481_p8, %p3090_p9  ;;  %s2486_s8 = scalar_lea.vmem %s2485_s5, 256 }
  0xc4   : > { %1955 = vmatmul.mubr.msk.f32.vlgmr.msra.gmra.mxu0 %vm566_vm1, %v2896_v7  ;;  %1968 = vmatprep.subr.mxu0 %v2578_v0  ;;  %p2487_p3 = scmp.lt.s32.totalorder %s1690_s14, %s2485_s5  ;;  %p2488_p4 = scmp.lt.s32.totalorder %s2486_s8, %s2480_s6 }
  0xc5   : > { %1969 = vmatpush3.msra.mxu0 %v724_v8  ;;  %1976 = vmatprep.mubr.msk.f32.mxu0 %vm2579_vm0, %v2578_v0  ;;  %p2483_p1 = pneg %p2482_p11 }
  0xc6   : > { %1970 = vmatprep.subr.mxu0 %v2578_v0  ;;  %1979 = vmatprep.subr.mxu1 %v2578_v0  ;;  %p2489_p0 = por %p2488_p4, %p2487_p3 }
  0xc7   : > { %1971 = vmatpush3.msra.mxu0 %v723_v10 }
  0xc8   : > { %1972 = vmatprep.subr.mxu0 %v2578_v0  ;;  %p2490_p6 = pnand %p2489_p0, %p2483_p1 }
  0xc9   : > { %1973 = vmatpush3.msra.mxu0 %v722_v11  ;;  %v1034_v11 = vld [vmem:[#allocation14 + $0x18] sm:$0xff] }
  0xca   : > { %1974 = vmatprep.subr.mxu0 %v2578_v0 }
  0xcb   : > { %1975 = vmatpush3.msra.mxu0 %v721_v12  ;;  %v1033_v12 = vld [vmem:[#allocation14 + $0x10] sm:$0xff] }
  0xcc   : > { %1977 = vmatmul.mubr.msk.f32.vlgmr.msra.gmra.mxu0 %vm566_vm1, %v2896_v7  ;;  %1990 = vmatprep.subr.mxu0 %v2578_v0 }
  0xcd   : > { %1998 = vmatprep.mubr.msk.f32.mxu0 %vm2579_vm0, %v2578_v0  ;;  %1991 = vmatpush3.msra.mxu0 %v879_v22 }
  0xce   : > { %1992 = vmatprep.subr.mxu0 %v2578_v0 }
  0xcf   : > { %1993 = vmatpush3.msra.mxu0 %v878_v23  ;;  %v1523_v23 = vld [vmem:[#allocation16 + $0x18] sm:$0xff] }
  0xd0   : > { %1994 = vmatprep.subr.mxu0 %v2578_v0 }
  0xd1   : > { %1995 = vmatpush3.msra.mxu0 %v877_v24  ;;  %v1522_v24 = vld [vmem:[#allocation16 + $0x10] sm:$0xff] }
  0xd2   : > { %1996 = vmatprep.subr.mxu0 %v2578_v0 }
  0xd3   : > { %1997 = vmatpush3.msra.mxu0 %v876_v25  ;;  %v1521_v25 = vld [vmem:[#allocation16 + $0x8] sm:$0xff] }
  0xd4   : > { %1999 = vmatmul.mubr.msk.f32.vlgmr.msra.gmra.mxu0 %vm566_vm1, %v2896_v7  ;;  %2012 = vmatprep.subr.mxu0 %v2578_v0 }
  0xd5   : > { %2014 = vmatprep.mubr.msk.f32.mxu0 %vm2579_vm0, %v2578_v0 }
 0x184   : > { %v636_v15 = vpop.f32.mrf.mxu0 }
 0x185   : > { %1966 = vmatmul.mubr.msk.f32.vlgmr.msra.gmra.mxu1 %vm566_vm1, %v636_v15 }
 0x186   : > { %v1956_v17 = vpop.f32.mrf.mxu0  ;;  %1980 = vmatpush3.msra.mxu1 %v798_v14  ;;  %1987 = vmatprep.mubr.msk.f32.mxu1 %vm2579_vm0, %v2578_v0 }
 0x187   : > { %1981 = vmatprep.subr.mxu1 %v2578_v0  ;;  %v1032_v17 = vld [vmem:[#allocation14 + $0x8] sm:$0xff] }
 0x188   : > { %1982 = vmatpush3.msra.mxu1 %v797_v16 }
 0x189   : > { %1983 = vmatprep.subr.mxu1 %v2578_v0 }
 0x18a   : > { %1984 = vmatpush3.msra.mxu1 %v796_v18  ;;  %v1031_v18 = vld [vmem:[#allocation14] sm:$0xff] }
 0x18b   : > { %1985 = vmatprep.subr.mxu1 %v2578_v0 }
 0x18c   : > { %v791_v20 = vpop.f32.mrf.mxu0  ;;  %1986 = vmatpush3.msra.mxu1 %v795_v19 }
 0x18d   : > { %1988 = vmatmul.mubr.msk.f32.vlgmr.msra.gmra.mxu1 %vm566_vm1, %v791_v20  ;;  %2001 = vmatprep.subr.mxu1 %v2578_v0 }
 0x18e   : > { %v1978_v21 = vpop.f32.mrf.mxu0  ;;  %2009 = vmatprep.mubr.msk.f32.mxu1 %vm2579_vm0, %v2578_v0  ;;  %2002 = vmatpush3.msra.mxu1 %v953_v41 }
 0x18f   : > { %2003 = vmatprep.subr.mxu1 %v2578_v0 }
 0x190   : > { %2004 = vmatpush3.msra.mxu1 %v952_v42 }
 0x191   : > { %2005 = vmatprep.subr.mxu1 %v2578_v0 }
 0x192   : > { %2006 = vmatpush3.msra.mxu1 %v951_v43 }
 0x193   : > { %2007 = vmatprep.subr.mxu1 %v2578_v0 }
 0x194   : > { %v946_v39 = vpop.f32.mrf.mxu0  ;;  %2008 = vmatpush3.msra.mxu1 %v950_v44 }
 0x195   : > { %2010 = vmatmul.mubr.msk.f32.vlgmr.msra.gmra.mxu1 %vm566_vm1, %v946_v39  ;;  %2017 = vmatprep.subr.mxu1 %v2578_v0 }
 0x196   : > { %v2000_v40 = vpop.f32.mrf.mxu0  ;;  %2019 = vmatprep.mubr.msk.f32.mxu1 %vm2579_vm0, %v2578_v0 }
 0x245   : > { %v717_v28 = vpop.f32.mrf.mxu1 }
 0x246   : > { %v718_v38 = vadd.f32 %v717_v28, %v647_v34  ;;  %v1599_v28 = vld [vmem:[#allocation17 + $0x10] sm:$0xff] }
 0x247   : > { %v1967_v30 = vpop.f32.mrf.mxu1 }
 0x24d   : > { %v872_v35 = vpop.f32.mrf.mxu1 }
 0x24e   : > { %v873_v36 = vadd.f32 %v872_v35, %v802_v33  ;;  %v1885_v33 = vld [vmem:[%s3049_s9] ss:$0 sm:$0xff] }
 0x24f   : > { %v1989_v37 = vpop.f32.mrf.mxu1 }
 0x250   : > { %1200 = vrot.lane.b32.xlu0 %v873_v36, %s2580_s28  ;;  %2013 = vmatpush3.xpose.msk.msra.mxu0 %vm1035_vm2, %v873_v36 }
 0x251   : > { %2022 = vmatprep.subr.mxu0 %v2578_v0 }
 0x253   : > { %2015 = vmatmul.mubr.msk.f32.vlgmr.msra.gmra.mxu0 %vm1035_vm2, %v718_v38 }
 0x254   : > { %1198 = vrot.lane.b32.xlu0 %v718_v38, %s2580_s28  ;;  %2024 = vmatprep.mubr.msk.f32.mxu0 %vm2579_vm0, %v2578_v0  ;;  %v1597_v38 = vld [vmem:[#allocation17] sm:$0xff] }
 0x255   : > { %v1027_v61 = vpop.f32.mrf.mxu1 }
 0x256   : > { %v1028_v1 = vadd.f32 %v1027_v61, %v957_v62 }
 0x257   : > { %v2011_v63 = vpop.f32.mrf.mxu1 }
 0x258   : > { %2018 = vmatpush3.msra.mxu1 %v1028_v1 }
 0x259   : > { %2027 = vmatprep.subr.mxu1 %v2578_v0 }
 0x2c2   : > { %v1201_v45 = vpop.permute.xlu0 %1200 }
 0x2c3   : > { %2023 = vmatpush3.xpose.msk.msra.mxu0 %vm1035_vm2, %v1201_v45 }
 0x2c4   : > { %2032 = vmatprep.subr.mxu0 %v2578_v0 }
 0x2c6   : > { %v1199_v46 = vpop.permute.xlu0 %1198 }
 0x2c7   : > { %2025 = vmatmul.mubr.msk.f32.vlgmr.msra.gmra.mxu0 %vm1035_vm2, %v1199_v46 }
 0x2c8   : > { %2036 = vmatprep.mubr.msk.f32.mxu0 %vm2579_vm0, %v2578_v0  ;;  %2033 = vmatpush3.msra.mxu0 %v1034_v11 }
 0x2c9   : > { %2034 = vmatprep.subr.mxu0 %v2578_v0 }
 0x2ca   : > { %2035 = vmatpush3.msra.mxu0 %v1033_v12 }
 0x2cb   : > { %2046 = vmatprep.subr.mxu0 %v2578_v0 }
 0x313   : > { %v1108_v47 = vpop.f32.mrf.mxu0 }
 0x314   : > { %v1112_v48 = vmul.f32 0.25, %v1108_v47 }
 0x315   : > { %v2016_v49 = vpop.f32.mrf.mxu0 }
 0x316   : > { %v1114_v50 = vsel %vm1113_vm3, %v1112_v48, -inf }
 0x317   : > { %1115 = vmax.xlane.f32.xlu1 %v1114_v50 }
 0x387   : > { %v1272_v51 = vpop.f32.mrf.mxu0 }
 0x388   : > { %v1276_v52 = vmul.f32 0.25, %v1272_v51 }
 0x389   : > { %v2026_v53 = vpop.f32.mrf.mxu0 }
 0x38a   : > { %v1277_v54 = vsel %vm1113_vm3, %v1276_v52, -inf }
 0x38b   : > { %1278 = vmax.xlane.f32.xlu1 %v1277_v54 }
 0x3a0   : > { %v1116_v55 = vpop.xlane.xlu1 %1115 }
 0x3a1   : > { %v1117_v56 = vsub.f32 %v1112_v48, %v1116_v55 }
 0x3a3   : > { %v1118_v57 = vmul.f32 1.442695, %v1117_v56 }
 0x3a5   : > { %2210 = vpow2.f32 %v1118_v57 }
 0x3b2   : > { %v2211_v58 = vpop.eup %2210 }
 0x3b3   : > { %v1120_v59 = vsel %vm1113_vm3, %v2211_v58, 0.0 }
 0x3b4   : > { %1121 = vadd.xlane.f32.xlu0 %v1120_v59 }
 0x414   : > { %v1279_v2 = vpop.xlane.xlu1 %1278 }
 0x415   : > { %v1280_v3 = vsub.f32 %v1276_v52, %v1279_v2 }
 0x417   : > { %v1281_v4 = vmul.f32 1.442695, %v1280_v3 }
 0x419   : > { %2212 = vpow2.f32 %v1281_v4 }
 0x426   : > { %v2213_v5 = vpop.eup %2212 }
 0x427   : > { %v1283_v6 = vsel %vm1113_vm3, %v2213_v5, 0.0 }
 0x428   : > { %1284 = vadd.xlane.f32.xlu1 %v1283_v6 }
 0x439   : > { %1289 = vrot.lane.b32.xlu1 %v1028_v1, %s2580_s28 }
 0x43d   : > { %v1122_v8 = vpop.xlane.xlu0 %1121 }
 0x43e   : > { %2214 = vrcp.f32 %v1122_v8 }
 0x44b   : > { %v2215_v9 = vpop.eup %2214 }
 0x44c   : > { %v1124_v10 = vmul.f32 %v2215_v9, %v2211_v58 }
 0x44e   : > { %2020 = vmatmul.mubr.msk.f32.vlgmr.msra.gmra.mxu1 %vm1113_vm3, %v1124_v10 }
 0x44f   : > { %2029 = vmatprep.mubr.msk.f32.mxu1 %vm2579_vm0, %v2578_v0 }
 0x4b1   : > { %v1285_v13 = vpop.xlane.xlu1 %1284 }
 0x4b2   : > { %2216 = vrcp.f32 %v1285_v13 }
 0x4b5   : > { %v1290_v14 = vpop.permute.xlu1 %1289 }
 0x4b6   : > { %2028 = vmatpush3.msra.mxu1 %v1290_v14 }
 0x4b7   : > { %2039 = vmatprep.subr.mxu1 %v2578_v0 }
 0x4bf   : > { %v2217_v15 = vpop.eup %2216 }
 0x4c0   : > { %v1287_v16 = vmul.f32 %v2217_v15, %v2213_v5 }
 0x4c2   : > { %2030 = vmatmul.mubr.msk.f32.vlgmr.msra.gmra.mxu1 %vm1113_vm3, %v1287_v16 }
 0x4c3   : > { %2040 = vmatpush3.msra.mxu1 %v1032_v17  ;;  %2043 = vmatprep.mubr.msk.f32.mxu1 %vm2579_vm0, %v2578_v0 }
 0x4c4   : > { %2041 = vmatprep.subr.mxu1 %v2578_v0 }
 0x4c5   : > { %2042 = vmatpush3.msra.mxu1 %v1031_v18 }
 0x4c6   : > { %2057 = vmatprep.subr.mxu1 %v2578_v0 }
 0x50e   : > { %v1194_v19 = vpop.f32.mrf.mxu1 }
 0x50f   : > { %2044 = vmatmul.mubr.msk.f32.vlgmr.msra.gmra.mxu1 %vm1035_vm2, %v1194_v19 }
 0x510   : > { %v2021_v20 = vpop.f32.mrf.mxu1  ;;  %2065 = vmatprep.mubr.msk.f32.mxu1 %vm2579_vm0, %v2578_v0  ;;  %2058 = vmatpush3.msra.mxu1 %v1600_v27 }
 0x511   : > { %2059 = vmatprep.subr.mxu1 %v2578_v0 }
 0x512   : > { %2060 = vmatpush3.msra.mxu1 %v1599_v28 }
 0x513   : > { %2061 = vmatprep.subr.mxu1 %v2578_v0 }
 0x514   : > { %2062 = vmatpush3.msra.mxu1 %v1598_v29 }
 0x515   : > { %2063 = vmatprep.subr.mxu1 %v2578_v0 }
 0x516   : > { %2064 = vmatpush3.msra.mxu1 %v1597_v38 }
 0x582   : > { %v1361_v21 = vpop.f32.mrf.mxu1 }
 0x583   : > { %2037 = vmatmul.mubr.msk.f32.vlgmr.msra.gmra.mxu0 %vm1035_vm2, %v1361_v21 }
 0x584   : > { %v2031_v22 = vpop.f32.mrf.mxu1  ;;  %2054 = vmatprep.mubr.msk.f32.mxu0 %vm2579_vm0, %v2578_v0  ;;  %2047 = vmatpush3.msra.mxu0 %v1523_v23 }
 0x585   : > { %2048 = vmatprep.subr.mxu0 %v2578_v0 }
 0x586   : > { %2049 = vmatpush3.msra.mxu0 %v1522_v24 }
 0x587   : > { %2050 = vmatprep.subr.mxu0 %v2578_v0 }
 0x588   : > { %2051 = vmatpush3.msra.mxu0 %v1521_v25 }
 0x589   : > { %2052 = vmatprep.subr.mxu0 %v2578_v0 }
 0x58a   : > { %2053 = vmatpush3.msra.mxu0 %v1520_v26 }
 0x5cf   : > { %v1507_v30 = vpop.f32.mrf.mxu1 }
 0x5d1   : > { %v2045_v31 = vpop.f32.mrf.mxu1 }
 0x643   : > { %v1434_v32 = vpop.f32.mrf.mxu0 }
 0x644   : > { %v1508_v34 = vadd.f32 %v1507_v30, %v1434_v32 }
 0x645   : > { %v2038_v35 = vpop.f32.mrf.mxu0 }
 0x646   : > { %v1518_v36 = vadd.f32 %v1885_v33, %v1508_v34 }
 0x648   : > { %v1519_v37 = vadd.f32 %v1518_v36, %v2896_v7 }
 0x64a   : > { %2055 = vmatmul.mubr.msk.f32.vlgmr.msra.gmra.mxu0 %vm566_vm1, %v1519_v37 }
 0x70a   : > { %v1593_v39 = vpop.f32.mrf.mxu0 }
 0x70b   : > { %2066 = vmatmul.mubr.msk.f32.vlgmr.msra.gmra.mxu1 %vm566_vm1, %v1593_v39 }
 0x70c   : > { %v2056_v0 = vpop.f32.mrf.mxu0 }
 0x7cb   : > { %v1670_v40 = vpop.f32.mrf.mxu1 }
 0x7cc   : > { %v1671_v41 = vadd.f32 %v1670_v40, %v1519_v37 }
 0x7cd   : > { %v2067_v7 = vpop.f32.mrf.mxu1 }
 0x7ce   : > { %1674 = vst.msk [vmem:[%s559_s1] sm:$0xff] %vm566_vm1, %v1671_v41 }
 0x7cf   : > { %2493 = shalt.err (!%p2490_p6)
}
 0x7d0   : > { %s2494_s2 = scalar_lea.hbm %s3002_s15, 128  ;;  %s2498_s28 = scalar_lea.hbm %s3052_s12, 256 }
 0x7d1   : > { %p2495_p5 = scmp.ne.s32.totalorder %s3002_s15, %s2494_s2  ;;  %p2499_p12 = scmp.lt.s32.totalorder %s3002_s15, %s3052_s12 }
 0x7d2   : > { %p2500_p2 = scmp.lt.s32.totalorder %s2498_s28, %s2494_s2 }
 0x7d3   : > { %p2496_p7 = pnand %p2495_p5, %p3090_p9 }
 0x7d4   : > { %p2501_p13 = por %p2500_p2, %p2499_p12 }
 0x7d5   : > { %p2497_p10 = pneg %p2496_p7 }
 0x7d7   : > { %p2502_p8 = pnand %p2501_p13, %p2497_p10 }
 0x7d9   : > { %2505 = shalt.err (!%p2502_p8)
}
 0x7da   : > { %2106 = dma.vmem_to_hbm [thread:$0]  (%p3090_p9), %s1690_s14, 128, %s3002_s15, %s1676_s19  }
 0x7db PF: > { %s1701_s13 = sand.u32 1, %s2552_s21   ;;  %p3091_p11 = scmp.ne.s32.totalorder %s3076_s17, 0 }
 0x7dc   : > { %p3092_p1 = scmp.ge.s32.totalorder %s2564_s24, 2  ;;  %s1702_s1 = scalar_lea.sflag [#allocation4], %s1701_s13 }
 0x7de   : > { %p2141_p3 = pnand %p3092_p1, %p3091_p11 }
 0x7e0   : > { %p2142_p4 = pneg %p2141_p3 }
 0x7e2   : > { %2547 = dma.done.wait (%p2142_p4), %s1702_s1, 128  }
 0x7e3   : > { %2549 = vsyncadd (%p2142_p4), %s1702_s1, 4294967168  ;;  %p30_p0 = scmp.ge.s32.totalorder %s2798_s16, 4   ;;  %s3093_s21 = smov %s2556_s22 }
 0x7e4   : > { %s3094_s22 = smov %s2560_s23  ;;  %s3095_s23 = smov %s2810_s25 }
 0x7e5   : > { %s3096_s24 = smov %s2798_s16  ;;  %32 = sbr.rel (!%p30_p0) target bundleno = 18 (0x12), region = 149 }
 0x7ea   :  { %1707 = vsyncpa [#allocation3], 1 }
 0x7eb   :  { %1709 = vsyncpa [#allocation3 + $0x1], 1 }
 0x7ec   :  { %1710 = vsyncpa [#allocation6], 1 }
 0x7ed   :  { %1711 = vsyncpa [#allocation9], 1 }
 0x7ee   :  { %1712 = vsyncpa [#allocation12], 1 }
 0x7ef   :  { %1713 = vsyncpa [#allocation15], 1 }
 0x7f0   :  { %1714 = vsyncpa [#allocation18], 1 }
 0x7f1   :  { %1715 = vsyncpa [#allocation4], 1 }
 0x7f2   :  { %1717 = vsyncpa [#allocation4 + $0x1], 1 }

</bundles_post_ra>
